<compile_context>
chip_gen: v5e
topology: v5e:2x2
jax: 0.10.0
libtpu: 0.0.40
codegen_flags: <defaults>
</compile_context>

<pallas_src>
import functools

import jax
import jax.numpy as jnp
from jax.experimental import pallas as pl
from jax.experimental.pallas import tpu as pltpu


def _round_up(n, m):
    return ((n + m - 1) // m) * m


def skipgram_kernel(x_ref, w_ref, b_ref, o_ref, acc_ref):
    # x_ref: (B, tk)   w_ref: (tk, D_pad)   b_ref: (1, D_pad)
    # o_ref: (B, D_pad)   acc_ref: (B, D_pad) f32 scratch
    k = pl.program_id(0)

    @pl.when(k == 0)
    def _():
        acc_ref[...] = jnp.zeros_like(acc_ref)

    # Partial product for this V-chunk; MXU matmul with f32 accumulation.
    acc_ref[...] += jnp.dot(
        x_ref[...], w_ref[...], preferred_element_type=jnp.float32
    )

    @pl.when(k == pl.num_programs(0) - 1)
    def _():
        y = acc_ref[...] + b_ref[...]
        # Softmax over dim=0 (the batch axis), numerically stable.
        m = jnp.max(y, axis=0, keepdims=True)
        e = jnp.exp(y - m)
        s = jnp.sum(e, axis=0, keepdims=True)
        inv = pl.reciprocal(s, approx=False)  # EUP reciprocal + vmul (not a divide)
        o_ref[...] = (e * inv).astype(o_ref.dtype)


@functools.partial(jax.jit, static_argnames=("tk",))
def skipgram_forward(x, weight, bias, *, tk=2048):
    """x: (B, V) f32, weight: (D, V) f32 (PyTorch layout), bias: (D,) f32 -> (B, D) f32."""
    B, V = x.shape
    D = weight.shape[0]

    # Pre-transpose the weight in the wrapper (free at trace time): (V, D).
    w_vd = weight.T

    # Lane-dense output: pad D to a multiple of 128.
    D_pad = _round_up(max(D, 128), 128)
    # V tile: multiple of 128, no larger than (padded) V.
    tk = min(_round_up(tk, 128), _round_up(V, 128))
    V_pad = _round_up(V, tk)

    # Zero-padding contributes nothing to the contraction; padded D columns get
    # bias 0 and are sliced off after the call (softmax is per-column).
    x_p = jnp.pad(x, ((0, 0), (0, V_pad - V)))
    w_p = jnp.pad(w_vd, ((0, V_pad - V), (0, D_pad - D)))
    b_p = jnp.pad(bias, (0, D_pad - D)).reshape(1, D_pad)

    grid = (V_pad // tk,)

    out = pl.pallas_call(
        skipgram_kernel,
        out_shape=jax.ShapeDtypeStruct((B, D_pad), jnp.float32),
        grid_spec=pltpu.PrefetchScalarGridSpec(
            num_scalar_prefetch=0,
            grid=grid,
            in_specs=[
                pl.BlockSpec((B, tk), lambda k: (0, k)),        # x chunk
                pl.BlockSpec((tk, D_pad), lambda k: (k, 0)),    # weight chunk
                pl.BlockSpec((1, D_pad), lambda k: (0, 0)),     # bias (resident)
            ],
            out_specs=pl.BlockSpec((B, D_pad), lambda k: (0, 0)),  # resident output
            scratch_shapes=[pltpu.VMEM((B, D_pad), jnp.float32)],  # f32 accumulator
        ),
        compiler_params=pltpu.CompilerParams(
            # V is a reduction axis (output block index constant across it).
            dimension_semantics=("arbitrary",),
            # Safe across v5e/v6e/v7x (v7x has only 64 MiB physical VMEM per TC);
            # tiles here are sized well under this even double-buffered.
            vmem_limit_bytes=48 * 1024 * 1024,
        ),
        cost_estimate=pl.CostEstimate(
            flops=2 * B * V_pad * D_pad,
            transcendentals=B * D_pad,
            bytes_accessed=4 * (B * V_pad + V_pad * D_pad + D_pad + B * D_pad),
        ),
    )(x_p, w_p, b_p)

    return out[:, :D]


def reference_forward(x, weight, bias):
    y = x @ weight.T + bias
    return jax.nn.softmax(y, axis=0)


if __name__ == "__main__":
    key = jax.random.PRNGKey(0)
    kx, kw, kb = jax.random.split(key, 3)

    batch = 8
    vocab_size = 32
    dimension = 16

    # Deterministic parameter init (PyTorch Linear default: U(-1/sqrt(in), 1/sqrt(in))).
    bound = 1.0 / (vocab_size ** 0.5)
    weight = jax.random.uniform(kw, (dimension, vocab_size), jnp.float32, -bound, bound)
    bias = jax.random.uniform(kb, (dimension,), jnp.float32, -bound, bound)

    # Example input (dense context vectors).
    x = jax.random.normal(kx, (batch, vocab_size), jnp.float32)

    out = skipgram_forward(x, weight, bias)
    out = jax.block_until_ready(out)

    ref = reference_forward(x, weight, bias)
    assert out.shape == (batch, dimension)
    assert jnp.allclose(out, ref, atol=1e-5, rtol=1e-5)

    print("KERNEL_OK")
</pallas_src>

<mosaic_0001>
module attributes {stable_mosaic.version = 11 : i64} {
  func.func @skipgram_kernel(%arg0: i32, %arg1: memref<8x128xf32, #tpu.memory_space<vmem>>, %arg2: memref<128x128xf32, #tpu.memory_space<vmem>>, %arg3: memref<1x128xf32, #tpu.memory_space<vmem>>, %arg4: memref<8x128xf32, #tpu.memory_space<vmem>>, %arg5: memref<8x128xf32, #tpu.memory_space<vmem>>) attributes {dimension_semantics = [#tpu.dimension_semantics<arbitrary>], iteration_bounds = array<i64: 1>, scalar_prefetch = 0 : i64, scratch_operands = 1 : i64, tpu.core_type = #tpu.core_type<tc>, window_params = [{transform_indices = @transform_0, window_bounds = array<i64: 8, 128>}, {transform_indices = @transform_1, window_bounds = array<i64: 128, 128>}, {pipeline_mode = #tpu.pipeline_mode<synchronous>, transform_indices = @transform_2, window_bounds = array<i64: 1, 128>}, {pipeline_mode = #tpu.pipeline_mode<synchronous>, transform_indices = @transform_3, window_bounds = array<i64: 8, 128>}]} {
    %c0_i32 = arith.constant 0 : i32
    %0 = arith.cmpi eq, %arg0, %c0_i32 : i32
    %1 = arith.extui %0 : i1 to i32
    %c0_i32_0 = arith.constant 0 : i32
    %2 = arith.cmpi ne, %1, %c0_i32_0 : i32
    scf.if %2 {
      %cst_10 = arith.constant 0.000000e+00 : f32
      %12 = vector.broadcast %cst_10 : f32 to vector<8x128xf32>
      %c0_11 = arith.constant 0 : index
      %c0_12 = arith.constant 0 : index
      %13 = vector.load %arg5[%c0_11, %c0_12] : memref<8x128xf32, #tpu.memory_space<vmem>>, vector<8x128xf32>
      tpu.vector_store %arg5[%c0_11, %c0_12], %12 {strides = array<i32>} : memref<8x128xf32, #tpu.memory_space<vmem>>, vector<8x128xf32>,
    } else {
    }
    %c0 = arith.constant 0 : index
    %c0_1 = arith.constant 0 : index
    %3 = vector.load %arg5[%c0, %c0_1] : memref<8x128xf32, #tpu.memory_space<vmem>>, vector<8x128xf32>
    %c0_2 = arith.constant 0 : index
    %c0_3 = arith.constant 0 : index
    %4 = vector.load %arg1[%c0_2, %c0_3] : memref<8x128xf32, #tpu.memory_space<vmem>>, vector<8x128xf32>
    %c0_4 = arith.constant 0 : index
    %c0_5 = arith.constant 0 : index
    %5 = vector.load %arg2[%c0_4, %c0_5] : memref<128x128xf32, #tpu.memory_space<vmem>>, vector<128x128xf32>
    %cst = arith.constant dense<0.000000e+00> : vector<8x128xf32>
    %6 = tpu.matmul %4, %5, %cst {dimension_numbers = #tpu.dot_dimension_numbers<[1], [0], [0], [1], [0, 0, 1, 1], [], []>} : vector<8x128xf32>, vector<128x128xf32>, vector<8x128xf32> -> vector<8x128xf32>
    %7 = arith.addf %3, %6 : vector<8x128xf32>
    %c0_6 = arith.constant 0 : index
    %c0_7 = arith.constant 0 : index
    %8 = vector.load %arg5[%c0_6, %c0_7] : memref<8x128xf32, #tpu.memory_space<vmem>>, vector<8x128xf32>
    tpu.vector_store %arg5[%c0_6, %c0_7], %7 {strides = array<i32>} : memref<8x128xf32, #tpu.memory_space<vmem>>, vector<8x128xf32>,
    %c0_i32_8 = arith.constant 0 : i32
    %9 = arith.cmpi eq, %arg0, %c0_i32_8 : i32
    %10 = arith.extui %9 : i1 to i32
    %c0_i32_9 = arith.constant 0 : i32
    %11 = arith.cmpi ne, %10, %c0_i32_9 : i32
    scf.if %11 {
      %c0_10 = arith.constant 0 : index
      %c0_11 = arith.constant 0 : index
      %12 = vector.load %arg5[%c0_10, %c0_11] : memref<8x128xf32, #tpu.memory_space<vmem>>, vector<8x128xf32>
      %c0_12 = arith.constant 0 : index
      %c0_13 = arith.constant 0 : index
      %13 = vector.load %arg3[%c0_12, %c0_13] : memref<1x128xf32, #tpu.memory_space<vmem>>, vector<1x128xf32>
      %14 = vector.broadcast %13 : vector<1x128xf32> to vector<8x128xf32>
      %15 = arith.addf %12, %14 : vector<8x128xf32>
      %cst_14 = arith.constant dense<0xFF800000> : vector<128xf32>
      %16 = vector.multi_reduction <maximumf>, %15, %cst_14 [0] : vector<8x128xf32> to vector<128xf32>
      %17 = vector.shape_cast %16 : vector<128xf32> to vector<1x128xf32>
      %18 = vector.broadcast %17 : vector<1x128xf32> to vector<8x128xf32>
      %19 = arith.subf %15, %18 : vector<8x128xf32>
      %20 = math.exp %19 : vector<8x128xf32>
      %cst_15 = arith.constant dense<0.000000e+00> : vector<128xf32>
      %21 = vector.multi_reduction <add>, %20, %cst_15 [0] : vector<8x128xf32> to vector<128xf32>
      %22 = vector.shape_cast %21 : vector<128xf32> to vector<1x128xf32>
      %23 = tpu.reciprocal %22 : vector<1x128xf32> -> vector<1x128xf32>
      %24 = vector.broadcast %23 : vector<1x128xf32> to vector<8x128xf32>
      %25 = arith.mulf %20, %24 : vector<8x128xf32>
      %c0_16 = arith.constant 0 : index
      %c0_17 = arith.constant 0 : index
      %26 = vector.load %arg4[%c0_16, %c0_17] : memref<8x128xf32, #tpu.memory_space<vmem>>, vector<8x128xf32>
      tpu.vector_store %arg4[%c0_16, %c0_17], %25 {strides = array<i32>} : memref<8x128xf32, #tpu.memory_space<vmem>>, vector<8x128xf32>,
    } else {
    }
    return
  }
  func.func @transform_0(%arg0: i32) -> (i32, i32) {
    %c0_i32 = arith.constant 0 : i32
    %c0_i32_0 = arith.constant 0 : i32
    return %c0_i32, %arg0 : i32, i32
  }
  func.func @transform_1(%arg0: i32) -> (i32, i32) {
    %c0_i32 = arith.constant 0 : i32
    %c0_i32_0 = arith.constant 0 : i32
    return %arg0, %c0_i32 : i32, i32
  }
  func.func @transform_2(%arg0: i32) -> (i32, i32) {
    %c0_i32 = arith.constant 0 : i32
    %c0_i32_0 = arith.constant 0 : i32
    %c0_i32_1 = arith.constant 0 : i32
    return %c0_i32, %c0_i32_0 : i32, i32
  }
  func.func @transform_3(%arg0: i32) -> (i32, i32) {
    %c0_i32 = arith.constant 0 : i32
    %c0_i32_0 = arith.constant 0 : i32
    %c0_i32_1 = arith.constant 0 : i32
    return %c0_i32, %c0_i32_0 : i32, i32
  }
}

</mosaic_0001>

<bundles_post_ra>
// kernel: skipgram_forward.1
= control target key start
LH: loop header
LB: loop body
LE: loop exit
PB: predicated region body
PF: predicated region fallthrough
CT: control target
= control target key end

     0   :  { %s226_s0 = inlined_call_operand.vmem [shape: f32[8,128], index: 0, kind: input, shape index: {}]   ;;  %s227_s1 = inlined_call_operand.vmem [shape: f32[128,128], index: 1, kind: input, shape index: {}]   ;;  %s228_s2 = inlined_call_operand.vmem [shape: f32[1,128], index: 2, kind: input, shape index: {}]   ;;  %s229_s3 = inlined_call_operand.hbm [shape: f32[8,128], index: 3, kind: output, shape index: {}]  }
   0x1   :  { %v37_v0 = vld [vmem:[%s227_s1 + $0x78] sm:$0xff]  ;;  %v36_v1 = vld [vmem:[%s227_s1 + $0x70] sm:$0xff]  ;;  %v35_v2 = vld [vmem:[%s227_s1 + $0x68] sm:$0xff] }
   0x2   :  { %38 = vmatpush.msra.mxu0 %v37_v0  ;;  %v34_v3 = vld [vmem:[%s227_s1 + $0x60] sm:$0xff]  ;;  %v33_v4 = vld [vmem:[%s227_s1 + $0x58] sm:$0xff] }
   0x4   :  { %39 = vmatpush.msra.mxu0 %v36_v1 }
   0x6   :  { %40 = vmatpush.msra.mxu0 %v35_v2 }
   0x7   :  { %8 = vsyncpa [#allocation4], 0  ;;  %v32_v5 = vld [vmem:[%s227_s1 + $0x50] sm:$0xff]  ;;  %v31_v6 = vld [vmem:[%s227_s1 + $0x48] sm:$0xff]  ;;  %s107_s22 = sshll.u32 %s229_s3, 4  ;;  %s108_s22 = int_to_ptr.hbm [resolvable:$true] %s107_s22 }
   0x8   :  { %41 = vmatpush.msra.mxu0 %v34_v3  ;;  %v30_v7 = vld [vmem:[%s227_s1 + $0x40] sm:$0xff]  ;;  %v29_v8 = vld [vmem:[%s227_s1 + $0x38] sm:$0xff]  ;;  %v28_v9 = vld [vmem:[%s227_s1 + $0x30] sm:$0xff] }
   0x9   :  { %v27_v10 = vld [vmem:[%s227_s1 + $0x28] sm:$0xff]  ;;  %v26_v11 = vld [vmem:[%s227_s1 + $0x20] sm:$0xff]  ;;  %v25_v12 = vld [vmem:[%s227_s1 + $0x18] sm:$0xff] }
   0xa   :  { %42 = vmatpush.msra.mxu0 %v33_v4  ;;  %v24_v13 = vld [vmem:[%s227_s1 + $0x10] sm:$0xff]  ;;  %v23_v14 = vld [vmem:[%s227_s1 + $0x8] sm:$0xff]  ;;  %v22_v15 = vld [vmem:[%s227_s1] sm:$0xff] }
   0xb   :  { %v21_v16 = vld [vmem:[%s226_s0] sm:$0xff]  ;;  %s148_s0 = smov [#allocation3]  }
   0xc   :  { %43 = vmatpush.msra.mxu0 %v32_v5  ;;  %v117_v17 = vld [vmem:[%s228_s2] ss:$0 sm:$0xff]  ;;  %s105_s1 = sshll.u32 %s148_s0, 4  ;;  %s106_s1 = int_to_ptr.vmem [resolvable:$true] %s105_s1 }
   0xe   :  { %44 = vmatpush.msra.mxu0 %v31_v6 }
  0x10   :  { %45 = vmatpush.msra.mxu0 %v30_v7 }
  0x12   :  { %46 = vmatpush.msra.mxu0 %v29_v8 }
  0x14   :  { %47 = vmatpush.msra.mxu0 %v28_v9 }
  0x16   :  { %48 = vmatpush.msra.mxu0 %v27_v10 }
  0x18   :  { %49 = vmatpush.msra.mxu0 %v26_v11 }
  0x1a   :  { %50 = vmatpush.msra.mxu0 %v25_v12 }
  0x1c   :  { %51 = vmatpush.msra.mxu0 %v24_v13 }
  0x1e   :  { %52 = vmatpush.msra.mxu0 %v23_v14 }
  0x20   :  { %53 = vmatpush.msra.mxu0 %v22_v15 }
  0x21   :  { %54 = vmatmul.f32.vlgmr.msra.gmra.mxu0 %v21_v16 }
  0x9e   :  { %v55_v18 = vpop.f32.mrf.mxu0 }
  0x9f   :  { %v68_v19 = vadd.f32 %v117_v17, %v55_v18 }
  0xa1   :  { %v69_v20 = vrot.slane %v68_v19, 4 }
  0xa3   :  { %v70_v21 = vmax.f32 %v68_v19, %v69_v20 }
  0xa5   :  { %v71_v22 = vrot.slane %v70_v21, 2 }
  0xa7   :  { %v72_v23 = vmax.f32 %v70_v21, %v71_v22 }
  0xa9   :  { %v73_v24 = vrot.slane %v72_v23, 1 }
  0xab   :  { %v74_v25 = vmax.f32 %v72_v23, %v73_v24 }
  0xad   :  { %v75_v26 = vsub.f32 %v68_v19, %v74_v25 }
  0xaf   :  { %v76_v27 = vmul.f32 1.442695, %v75_v26 }
  0xb1   :  { %118 = vpow2.f32 %v76_v27 }
  0xb7   :  { %v119_v28 = vpop.eup %118 }
  0xb8   :  { %v78_v29 = vrot.slane %v119_v28, 4 }
  0xba   :  { %v79_v30 = vadd.f32 %v119_v28, %v78_v29 }
  0xbc   :  { %v80_v31 = vrot.slane %v79_v30, 2 }
  0xbe   :  { %v81_v32 = vadd.f32 %v80_v31, %v79_v30 }
  0xc0   :  { %v82_v33 = vrot.slane %v81_v32, 1 }
  0xc2   :  { %v83_v34 = vadd.f32 %v82_v33, %v81_v32 }
  0xc4   :  { %120 = vrcp.f32 %v83_v34  ;;  %v95_v38 = vand.u32 2147483648, %v83_v34  ;;  %v93_v40 = vand.u32 2147483647, %v83_v34  ;;  %vm89_vm1 = vweird.f32 %v83_v34 }
  0xc6   :  { %v96_v42 = vor.u32 1.1754944e-38, %v95_v38  ;;  %vm94_vm3 = vcmp.eq.f32.partialorder %v93_v40, 8.507059e+37 }
  0xca   :  { %v121_v35 = vpop.eup %120 }
  0xcb   :  { %v85_v36 = vmul.f32 %v121_v35, %v83_v34  ;;  %vm90_vm0 = vweird.f32 %v121_v35 }
  0xcc   :  { %vm91_vm2 = vmor %vm89_vm1, %vm90_vm0 }
  0xcd   :  { %v86_v37 = vsub.f32 1.0, %v85_v36 }
  0xcf   :  { %v87_v39 = vmul.f32 %v121_v35, %v86_v37 }
  0xd1   :  { %v88_v41 = vadd.f32 %v121_v35, %v87_v39 }
  0xd3   :  { %v92_v43 = vsel %vm91_vm2, %v121_v35, %v88_v41 }
  0xd4   :  { %v97_v44 = vsel %vm94_vm3, %v96_v42, %v92_v43 }
  0xd5   :  { %v98_v45 = vmul.f32 %v119_v28, %v97_v44 }
  0xd7   :  { %99 = vst [vmem:[#allocation3] sm:$0xff] %v98_v45 }
  0xd8   :  { %110 = dma.vmem_to_hbm [thread:$0]  %s106_s1, 128, %s108_s22, [#allocation4]  }
  0xd9   :  { %146 = dma.done.wait [#allocation4], 128  }
  0xda   :  { %147 = vsyncadd [#allocation4], 4294967168 }
  0xdb   :  { %115 = vsyncpa [#allocation4], 1 }

</bundles_post_ra>
